<compile_context>
chip_gen: v7x
topology: tpu7x:2x2x1
jax: 0.10.0
libtpu: 0.0.40
codegen_flags: <defaults>
</compile_context>

<pallas_src>
import functools

import numpy as np
import jax
import jax.numpy as jnp
from jax import lax
from jax.experimental import pallas as pl
from jax.experimental.pallas import tpu as pltpu


def _cdiv(a, b):
    return -(-a // b)


def _round_up(a, b):
    return _cdiv(a, b) * b


# --------------------------------------------------------------------------
# Kernel: one-hot segment-sum, pixels on lanes, channels on sublanes.
# --------------------------------------------------------------------------
def _segment_sum_kernel(pred_ref, tgt_ref, nuc_ref,
                        ptab_ref, ttab_ref, ctab_ref,
                        *, l_max, chunk, n_chunks, tile, n_tiles, hw,
                        needs_mask):
    s = pl.program_id(1)
    t = pl.program_id(2)

    @pl.when(t == 0)
    def _():
        ptab_ref[...] = jnp.zeros_like(ptab_ref)
        ttab_ref[...] = jnp.zeros_like(ttab_ref)
        ctab_ref[...] = jnp.zeros_like(ctab_ref)

    c_dim = pred_ref.shape[0]

    # Hoisted constants — JAX does not CSE broadcast_in_dim, so building these
    # inside the chunk loop would replicate them per iteration.
    lbl_ids = lax.broadcasted_iota(jnp.int32, (l_max, chunk), 0)   # label id per sublane
    ones_row = jnp.ones((1, chunk), jnp.float32)
    if needs_mask:
        pix_ids = lax.broadcasted_iota(jnp.int32, (1, chunk), 1)
        tile_start = (s * n_tiles + t) * tile

    dn_nt = (((1,), (1,)), ((), ()))   # contract the pixel axis of both operands

    def chunk_body(c, carry):
        acc_p, acc_t, acc_c = carry
        start = pl.multiple_of(c * chunk, chunk)
        p = pred_ref[:, pl.ds(start, chunk)]        # [C, chunk] f32
        tg = tgt_ref[:, pl.ds(start, chunk)]        # [C, chunk] f32
        lab = nuc_ref[:, pl.ds(start, chunk)]       # [1, chunk] i32

        if needs_mask:
            valid = (tile_start + start + pix_ids) < hw        # [1, chunk]
            lab = jnp.where(valid, lab, -1)    # ragged/garbage pixels match no label
            p = jnp.where(valid, p, 0.0)       # keep OOB garbage out of the sums
            tg = jnp.where(valid, tg, 0.0)

        onehot = (lab == lbl_ids).astype(jnp.float32)           # [l_max, chunk], exact 0/1

        acc_p = acc_p + lax.dot_general(p, onehot, dn_nt,
                                        preferred_element_type=jnp.float32)
        acc_t = acc_t + lax.dot_general(tg, onehot, dn_nt,
                                        preferred_element_type=jnp.float32)
        acc_c = acc_c + lax.dot_general(ones_row, onehot, dn_nt,
                                        preferred_element_type=jnp.float32)
        return acc_p, acc_t, acc_c

    init = (jnp.zeros((c_dim, l_max), jnp.float32),
            jnp.zeros((c_dim, l_max), jnp.float32),
            jnp.zeros((1, l_max), jnp.float32))
    acc_p, acc_t, acc_c = lax.fori_loop(0, n_chunks, chunk_body, init)

    ptab_ref[...] += acc_p                                      # VMEM-resident accumulators
    ttab_ref[...] += acc_t
    ctab_ref[...] += acc_c


# --------------------------------------------------------------------------
# Wrapper: dense per-batch per-label mean tables (fully jitted).
# --------------------------------------------------------------------------
@functools.partial(jax.jit,
                   static_argnames=("tile_pixels", "chunk_pixels",
                                    "num_spatial_splits", "l_max"))
def mean_cell_tables(pred, target, nuclei, *, tile_pixels=8192,
                     chunk_pixels=128, num_spatial_splits=1, l_max=128):
    """pred, target: [B, C, H, W] (target may be None); nuclei: [B,1,H,W] or
    [B,H,W] integer labels in [0, l_max).  Returns dense tables
    (pred_means [B, l_max, C], target_means [B, l_max, C], counts [B, l_max, 1])
    with row index == label id (row 0 = background).
    num_spatial_splits=2 is useful on TPU v7x only when B == 1 (the parallel
    batch axis already feeds both TensorCores when B >= 2)."""
    if target is None:
        target = jnp.zeros_like(pred)
    if nuclei.ndim == 3:
        nuclei = nuclei[:, None]
    # TODO(synk): scale_factor < 1.0 (F.interpolate 'area' / 'nearest-exact'
    # downscale) is not implemented; this corresponds to scale_factor=1.0.

    B, C, H, W = pred.shape
    HW = H * W
    S = int(num_spatial_splits)
    l_max = int(l_max)

    # ---- channel-major views: free reshapes, no transpose / concat / pad ----
    pred3 = pred.reshape(B, C, HW).astype(jnp.float32)
    tgt3 = target.reshape(B, C, HW).astype(jnp.float32)
    nuc3 = nuclei.reshape(B, 1, HW).astype(jnp.int32)

    hw_arr = HW
    if HW < 128:                       # tiny images: pad up to one lane quantum
        pad = 128 - HW
        pred3 = jnp.pad(pred3, ((0, 0), (0, 0), (0, pad)))
        tgt3 = jnp.pad(tgt3, ((0, 0), (0, 0), (0, pad)))
        nuc3 = jnp.pad(nuc3, ((0, 0), (0, 0), (0, pad)))
        hw_arr = 128

    # ---- tiling: chunk and tile are multiples of the 128-lane quantum ------
    per_split = _cdiv(hw_arr, S)
    chunk = _round_up(min(max(int(chunk_pixels), 1), per_split), 128)
    tile = _round_up(min(max(int(tile_pixels), chunk), per_split), chunk)
    n_chunks = tile // chunk
    n_tiles = _cdiv(per_split, tile)
    last_blk = _cdiv(hw_arr, tile) - 1     # clamp so no DMA starts past the array
    needs_mask = (S * n_tiles * tile != HW)

    def in_map(b, s, t):
        return (b, 0, jnp.minimum(s * n_tiles + t, last_blk))

    kernel = functools.partial(
        _segment_sum_kernel, l_max=l_max, chunk=chunk, n_chunks=n_chunks,
        tile=tile, n_tiles=n_tiles, hw=HW, needs_mask=needs_mask)

    grid_spec = pltpu.PrefetchScalarGridSpec(
        num_scalar_prefetch=0,
        grid=(B, S, n_tiles),
        in_specs=[
            pl.BlockSpec((None, C, tile), in_map),
            pl.BlockSpec((None, C, tile), in_map),
            pl.BlockSpec((None, 1, tile), in_map),
        ],
        out_specs=[
            pl.BlockSpec((None, None, C, l_max), lambda b, s, t: (b, s, 0, 0)),
            pl.BlockSpec((None, None, C, l_max), lambda b, s, t: (b, s, 0, 0)),
            pl.BlockSpec((None, None, 1, l_max), lambda b, s, t: (b, s, 0, 0)),
        ],
    )

    ptab, ttab, ctab = pl.pallas_call(
        kernel,
        out_shape=(jax.ShapeDtypeStruct((B, S, C, l_max), jnp.float32),
                   jax.ShapeDtypeStruct((B, S, C, l_max), jnp.float32),
                   jax.ShapeDtypeStruct((B, S, 1, l_max), jnp.float32)),
        grid_spec=grid_spec,
        compiler_params=pltpu.CompilerParams(
            dimension_semantics=("parallel", "parallel", "arbitrary"),
            # Dense layout: a tile of 8192 px at C=4 is ~0.3 MiB double-buffered,
            # so 32 MiB leaves ample headroom (and stays within v7x's scoped cap).
            vmem_limit_bytes=32 * 1024 * 1024,
        ),
    )(pred3, tgt3, nuc3)

    psum = jnp.transpose(ptab.sum(axis=1), (0, 2, 1))   # [B, l_max, C]
    tsum = jnp.transpose(ttab.sum(axis=1), (0, 2, 1))   # [B, l_max, C]
    cnt = jnp.transpose(ctab.sum(axis=1), (0, 2, 1))    # [B, l_max, 1]
    safe = jnp.where(cnt > 0, cnt, jnp.ones_like(cnt))
    return psum / safe, tsum / safe, cnt


# --------------------------------------------------------------------------
# Variable-length output (matches the PyTorch module exactly).
# --------------------------------------------------------------------------
def mean_cell_extractor(pred, target, nuclei, *, check_labels=False, **kwargs):
    """Reproduces MeanCellExtrator.forward (scale_factor=1.0): returns
    (pred_means [N, C], target_means [N, C], cell_ids [N]) where per-batch
    labels are sorted ascending and concatenated over the batch."""
    if check_labels:  # optional host-sync guard: labels >= l_max would be dropped
        l_max = int(kwargs.get("l_max", 128))
        assert int(jnp.max(nuclei)) < l_max, "nuclei label id >= l_max; raise l_max"
    pm, tm, cnt = mean_cell_tables(pred, target, nuclei, **kwargs)
    pm, tm, cnt = jax.device_get((pm, tm, cnt))          # single transfer
    present = cnt[:, 1:, 0] > 0                          # skip background
    b_idx, l_idx = np.nonzero(present)                   # row-major == per-batch sorted
    labels = (l_idx + 1).astype(np.int32)
    return (pm[b_idx, labels].astype(np.float32),
            tm[b_idx, labels].astype(np.float32),
            labels)


# --------------------------------------------------------------------------
# Pure-numpy reference (mirrors the PyTorch extract_mean).
# --------------------------------------------------------------------------
def _numpy_reference(pred, target, nuclei):
    pred = np.asarray(pred); target = np.asarray(target); nuclei = np.asarray(nuclei)
    B, C, H, W = pred.shape
    pms, tms, cids = [], [], []
    for b in range(B):
        nuc = nuclei[b, 0].reshape(-1)
        p = pred[b].transpose(1, 2, 0).reshape(-1, C)
        t = target[b].transpose(1, 2, 0).reshape(-1, C)
        mask = nuc > 0
        if not mask.any():
            continue
        for lbl in np.unique(nuc[mask]):
            m = nuc == lbl
            pms.append(p[m].mean(0))
            tms.append(t[m].mean(0))
            cids.append(lbl)
    return (np.asarray(pms, np.float32), np.asarray(tms, np.float32),
            np.asarray(cids, np.int32))


if __name__ == "__main__":
    key = jax.random.PRNGKey(0)
    k1, k2, k3, k4, k5 = jax.random.split(key, 5)

    # Test 1: default config on the module's canonical small shapes.
    B, C, H, W = 2, 4, 16, 16
    pred = jax.random.normal(k1, (B, C, H, W), dtype=jnp.float32)
    target = jax.random.normal(k2, (B, C, H, W), dtype=jnp.float32)
    nuclei = jax.random.randint(k3, (B, 1, H, W), 0, 8, dtype=jnp.int32)

    pm, tm, ids = mean_cell_extractor(pred, target, nuclei, check_labels=True)
    pm_ref, tm_ref, ids_ref = _numpy_reference(pred, target, nuclei)
    np.testing.assert_array_equal(ids, ids_ref)
    np.testing.assert_allclose(pm, pm_ref, rtol=1e-5, atol=1e-5)
    np.testing.assert_allclose(tm, tm_ref, rtol=1e-5, atol=1e-5)

    # Test 2: non-divisible spatial size (ragged-tail mask + block-index clamp),
    # target=None, multi-tile, and the 2-way spatial split (v7x megacore, B==1).
    B2, C2, H2, W2 = 1, 4, 19, 19
    pred2 = jax.random.normal(k4, (B2, C2, H2, W2), dtype=jnp.float32)
    nuclei2 = jax.random.randint(k5, (B2, 1, H2, W2), 0, 30, dtype=jnp.int32)

    pm2, tm2, ids2 = mean_cell_extractor(
        pred2, None, nuclei2,
        tile_pixels=128, chunk_pixels=128, num_spatial_splits=2)
    pm2_ref, tm2_ref, ids2_ref = _numpy_reference(
        pred2, np.zeros(pred2.shape, np.float32), nuclei2)
    np.testing.assert_array_equal(ids2, ids2_ref)
    np.testing.assert_allclose(pm2, pm2_ref, rtol=1e-5, atol=1e-5)
    np.testing.assert_allclose(tm2, tm2_ref, rtol=1e-5, atol=1e-5)

    jax.block_until_ready(mean_cell_tables(pred, target, nuclei)[0])
    print("KERNEL_OK")
</pallas_src>

<mosaic_0001>
module attributes {stable_mosaic.version = 11 : i64} {
  func.func @_segment_sum_kernel(%arg0: i32, %arg1: i32, %arg2: i32, %arg3: memref<1x4x256xf32, #tpu.memory_space<vmem>>, %arg4: memref<1x4x256xf32, #tpu.memory_space<vmem>>, %arg5: memref<1x1x256xi32, #tpu.memory_space<vmem>>, %arg6: memref<1x1x4x128xf32, #tpu.memory_space<vmem>>, %arg7: memref<1x1x4x128xf32, #tpu.memory_space<vmem>>, %arg8: memref<1x1x1x128xf32, #tpu.memory_space<vmem>>) attributes {dimension_semantics = [#tpu.dimension_semantics<parallel>, #tpu.dimension_semantics<parallel>, #tpu.dimension_semantics<arbitrary>], iteration_bounds = array<i64: 2, 1, 1>, scalar_prefetch = 0 : i64, scratch_operands = 0 : i64, tpu.core_type = #tpu.core_type<tc>, window_params = [{transform_indices = @transform_0, window_bounds = array<i64: 1, 4, 256>}, {transform_indices = @transform_1, window_bounds = array<i64: 1, 4, 256>}, {transform_indices = @transform_2, window_bounds = array<i64: 1, 1, 256>}, {transform_indices = @transform_3, window_bounds = array<i64: 1, 1, 4, 128>}, {transform_indices = @transform_4, window_bounds = array<i64: 1, 1, 4, 128>}, {transform_indices = @transform_5, window_bounds = array<i64: 1, 1, 1, 128>}]} {
    %c0_i32 = arith.constant 0 : i32
    %0 = arith.cmpi eq, %arg2, %c0_i32 : i32
    %1 = arith.extui %0 : i1 to i32
    %c0_i32_0 = arith.constant 0 : i32
    %2 = arith.cmpi ne, %1, %c0_i32_0 : i32
    scf.if %2 {
      %cst_29 = arith.constant 0.000000e+00 : f32
      %28 = vector.broadcast %cst_29 : f32 to vector<4x128xf32>
      %c0_30 = arith.constant 0 : index
      %c0_31 = arith.constant 0 : index
      %c0_32 = arith.constant 0 : index
      %c0_33 = arith.constant 0 : index
      %29 = vector.load %arg6[%c0_30, %c0_31, %c0_32, %c0_33] : memref<1x1x4x128xf32, #tpu.memory_space<vmem>>, vector<1x1x4x128xf32>
      %30 = vector.shape_cast %29 : vector<1x1x4x128xf32> to vector<4x128xf32>
      %31 = vector.shape_cast %28 : vector<4x128xf32> to vector<1x1x4x128xf32>
      tpu.vector_store %arg6[%c0_30, %c0_31, %c0_32, %c0_33], %31 {strides = array<i32>} : memref<1x1x4x128xf32, #tpu.memory_space<vmem>>, vector<1x1x4x128xf32>,
      %cst_34 = arith.constant 0.000000e+00 : f32
      %32 = vector.broadcast %cst_34 : f32 to vector<4x128xf32>
      %c0_35 = arith.constant 0 : index
      %c0_36 = arith.constant 0 : index
      %c0_37 = arith.constant 0 : index
      %c0_38 = arith.constant 0 : index
      %33 = vector.load %arg7[%c0_35, %c0_36, %c0_37, %c0_38] : memref<1x1x4x128xf32, #tpu.memory_space<vmem>>, vector<1x1x4x128xf32>
      %34 = vector.shape_cast %33 : vector<1x1x4x128xf32> to vector<4x128xf32>
      %35 = vector.shape_cast %32 : vector<4x128xf32> to vector<1x1x4x128xf32>
      tpu.vector_store %arg7[%c0_35, %c0_36, %c0_37, %c0_38], %35 {strides = array<i32>} : memref<1x1x4x128xf32, #tpu.memory_space<vmem>>, vector<1x1x4x128xf32>,
      %cst_39 = arith.constant 0.000000e+00 : f32
      %36 = vector.broadcast %cst_39 : f32 to vector<1x128xf32>
      %c0_40 = arith.constant 0 : index
      %c0_41 = arith.constant 0 : index
      %c0_42 = arith.constant 0 : index
      %c0_43 = arith.constant 0 : index
      %37 = vector.load %arg8[%c0_40, %c0_41, %c0_42, %c0_43] : memref<1x1x1x128xf32, #tpu.memory_space<vmem>>, vector<1x1x1x128xf32>
      %38 = vector.shape_cast %37 : vector<1x1x1x128xf32> to vector<1x128xf32>
      %39 = vector.shape_cast %36 : vector<1x128xf32> to vector<1x1x1x128xf32>
      tpu.vector_store %arg8[%c0_40, %c0_41, %c0_42, %c0_43], %39 {strides = array<i32>} : memref<1x1x1x128xf32, #tpu.memory_space<vmem>>, vector<1x1x1x128xf32>,
    } else {
    }
    %3 = tpu.iota {dimensions = array<i32: 0>} : vector<128x128xi32>
    %cst = arith.constant 1.000000e+00 : f32
    %4 = vector.broadcast %cst : f32 to vector<1x128xf32>
    %cst_1 = arith.constant 0.000000e+00 : f32
    %5 = vector.broadcast %cst_1 : f32 to vector<4x128xf32>
    %cst_2 = arith.constant 0.000000e+00 : f32
    %6 = vector.broadcast %cst_2 : f32 to vector<4x128xf32>
    %cst_3 = arith.constant 0.000000e+00 : f32
    %7 = vector.broadcast %cst_3 : f32 to vector<1x128xf32>
    %c0_i32_4 = arith.constant 0 : i32
    %c2_i32 = arith.constant 2 : i32
    %8 = arith.addi %c0_i32_4, %c2_i32 : i32
    %c1_i32 = arith.constant 1 : i32
    %9:3 = scf.for %arg9 = %c0_i32_4 to %8 step %c1_i32 iter_args(%arg10 = %5, %arg11 = %6, %arg12 = %7) -> (vector<4x128xf32>, vector<4x128xf32>, vector<1x128xf32>)  : i32 {
      %c128_i32 = arith.constant 128 : i32
      %28 = arith.muli %arg9, %c128_i32 : i32
      %29 = tpu.assume_multiple %28, 128 : i32
      %c0_29 = arith.constant 0 : index
      %c0_30 = arith.constant 0 : index
      %30 = arith.index_cast %29 : i32 to index
      %31 = vector.load %arg3[%c0_29, %c0_30, %30] : memref<1x4x256xf32, #tpu.memory_space<vmem>>, vector<1x4x128xf32>
      %32 = vector.shape_cast %31 : vector<1x4x128xf32> to vector<4x128xf32>
      %c0_31 = arith.constant 0 : index
      %c0_32 = arith.constant 0 : index
      %33 = arith.index_cast %29 : i32 to index
      %34 = vector.load %arg4[%c0_31, %c0_32, %33] : memref<1x4x256xf32, #tpu.memory_space<vmem>>, vector<1x4x128xf32>
      %35 = vector.shape_cast %34 : vector<1x4x128xf32> to vector<4x128xf32>
      %c0_33 = arith.constant 0 : index
      %c0_34 = arith.constant 0 : index
      %36 = arith.index_cast %29 : i32 to index
      %37 = vector.load %arg5[%c0_33, %c0_34, %36] : memref<1x1x256xi32, #tpu.memory_space<vmem>>, vector<1x1x128xi32>
      %38 = vector.shape_cast %37 : vector<1x1x128xi32> to vector<1x128xi32>
      %39 = vector.broadcast %38 : vector<1x128xi32> to vector<128x128xi32>
      %40 = arith.cmpi eq, %39, %3 : vector<128x128xi32>
      %41 = arith.extui %40 : vector<128x128xi1> to vector<128x128xi32>
      %42 = arith.sitofp %41 : vector<128x128xi32> to vector<128x128xf32>
      %cst_35 = arith.constant dense<0.000000e+00> : vector<4x128xf32>
      %43 = tpu.matmul %32, %42, %cst_35 {dimension_numbers = #tpu.dot_dimension_numbers<[1], [1], [0], [0], [0, 0, 1, 0], [], []>} : vector<4x128xf32>, vector<128x128xf32>, vector<4x128xf32> -> vector<4x128xf32>
      %44 = arith.addf %arg10, %43 : vector<4x128xf32>
      %cst_36 = arith.constant dense<0.000000e+00> : vector<4x128xf32>
      %45 = tpu.matmul %35, %42, %cst_36 {dimension_numbers = #tpu.dot_dimension_numbers<[1], [1], [0], [0], [0, 0, 1, 0], [], []>} : vector<4x128xf32>, vector<128x128xf32>, vector<4x128xf32> -> vector<4x128xf32>
      %46 = arith.addf %arg11, %45 : vector<4x128xf32>
      %cst_37 = arith.constant dense<0.000000e+00> : vector<1x128xf32>
      %47 = tpu.matmul %4, %42, %cst_37 {dimension_numbers = #tpu.dot_dimension_numbers<[1], [1], [0], [0], [0, 0, 1, 0], [], []>} : vector<1x128xf32>, vector<128x128xf32>, vector<1x128xf32> -> vector<1x128xf32>
      %48 = arith.addf %arg12, %47 : vector<1x128xf32>
      scf.yield %44, %46, %48 : vector<4x128xf32>, vector<4x128xf32>, vector<1x128xf32>
    }
    %c2_i32_5 = arith.constant 2 : i32
    %c0 = arith.constant 0 : index
    %c0_6 = arith.constant 0 : index
    %c0_7 = arith.constant 0 : index
    %c0_8 = arith.constant 0 : index
    %10 = vector.load %arg6[%c0, %c0_6, %c0_7, %c0_8] : memref<1x1x4x128xf32, #tpu.memory_space<vmem>>, vector<1x1x4x128xf32>
    %11 = vector.shape_cast %10 : vector<1x1x4x128xf32> to vector<4x128xf32>
    %12 = arith.addf %11, %9#0 : vector<4x128xf32>
    %c0_9 = arith.constant 0 : index
    %c0_10 = arith.constant 0 : index
    %c0_11 = arith.constant 0 : index
    %c0_12 = arith.constant 0 : index
    %13 = vector.load %arg6[%c0_9, %c0_10, %c0_11, %c0_12] : memref<1x1x4x128xf32, #tpu.memory_space<vmem>>, vector<1x1x4x128xf32>
    %14 = vector.shape_cast %13 : vector<1x1x4x128xf32> to vector<4x128xf32>
    %15 = vector.shape_cast %12 : vector<4x128xf32> to vector<1x1x4x128xf32>
    tpu.vector_store %arg6[%c0_9, %c0_10, %c0_11, %c0_12], %15 {strides = array<i32>} : memref<1x1x4x128xf32, #tpu.memory_space<vmem>>, vector<1x1x4x128xf32>,
    %c0_13 = arith.constant 0 : index
    %c0_14 = arith.constant 0 : index
    %c0_15 = arith.constant 0 : index
    %c0_16 = arith.constant 0 : index
    %16 = vector.load %arg7[%c0_13, %c0_14, %c0_15, %c0_16] : memref<1x1x4x128xf32, #tpu.memory_space<vmem>>, vector<1x1x4x128xf32>
    %17 = vector.shape_cast %16 : vector<1x1x4x128xf32> to vector<4x128xf32>
    %18 = arith.addf %17, %9#1 : vector<4x128xf32>
    %c0_17 = arith.constant 0 : index
    %c0_18 = arith.constant 0 : index
    %c0_19 = arith.constant 0 : index
    %c0_20 = arith.constant 0 : index
    %19 = vector.load %arg7[%c0_17, %c0_18, %c0_19, %c0_20] : memref<1x1x4x128xf32, #tpu.memory_space<vmem>>, vector<1x1x4x128xf32>
    %20 = vector.shape_cast %19 : vector<1x1x4x128xf32> to vector<4x128xf32>
    %21 = vector.shape_cast %18 : vector<4x128xf32> to vector<1x1x4x128xf32>
    tpu.vector_store %arg7[%c0_17, %c0_18, %c0_19, %c0_20], %21 {strides = array<i32>} : memref<1x1x4x128xf32, #tpu.memory_space<vmem>>, vector<1x1x4x128xf32>,
    %c0_21 = arith.constant 0 : index
    %c0_22 = arith.constant 0 : index
    %c0_23 = arith.constant 0 : index
    %c0_24 = arith.constant 0 : index
    %22 = vector.load %arg8[%c0_21, %c0_22, %c0_23, %c0_24] : memref<1x1x1x128xf32, #tpu.memory_space<vmem>>, vector<1x1x1x128xf32>
    %23 = vector.shape_cast %22 : vector<1x1x1x128xf32> to vector<1x128xf32>
    %24 = arith.addf %23, %9#2 : vector<1x128xf32>
    %c0_25 = arith.constant 0 : index
    %c0_26 = arith.constant 0 : index
    %c0_27 = arith.constant 0 : index
    %c0_28 = arith.constant 0 : index
    %25 = vector.load %arg8[%c0_25, %c0_26, %c0_27, %c0_28] : memref<1x1x1x128xf32, #tpu.memory_space<vmem>>, vector<1x1x1x128xf32>
    %26 = vector.shape_cast %25 : vector<1x1x1x128xf32> to vector<1x128xf32>
    %27 = vector.shape_cast %24 : vector<1x128xf32> to vector<1x1x1x128xf32>
    tpu.vector_store %arg8[%c0_25, %c0_26, %c0_27, %c0_28], %27 {strides = array<i32>} : memref<1x1x1x128xf32, #tpu.memory_space<vmem>>, vector<1x1x1x128xf32>,
    return
  }
  func.func @transform_0(%arg0: i32, %arg1: i32, %arg2: i32) -> (i32, i32, i32) {
    %c1_i32 = arith.constant 1 : i32
    %0 = arith.muli %arg1, %c1_i32 : i32
    %1 = arith.addi %0, %arg2 : i32
    %c0_i32 = arith.constant 0 : i32
    %2 = arith.minsi %1, %c0_i32 : i32
    %c0_i32_0 = arith.constant 0 : i32
    %c0_i32_1 = arith.constant 0 : i32
    return %arg0, %c0_i32_0, %2 : i32, i32, i32
  }
  func.func @transform_1(%arg0: i32, %arg1: i32, %arg2: i32) -> (i32, i32, i32) {
    %c1_i32 = arith.constant 1 : i32
    %0 = arith.muli %arg1, %c1_i32 : i32
    %1 = arith.addi %0, %arg2 : i32
    %c0_i32 = arith.constant 0 : i32
    %2 = arith.minsi %1, %c0_i32 : i32
    %c0_i32_0 = arith.constant 0 : i32
    %c0_i32_1 = arith.constant 0 : i32
    return %arg0, %c0_i32_0, %2 : i32, i32, i32
  }
  func.func @transform_2(%arg0: i32, %arg1: i32, %arg2: i32) -> (i32, i32, i32) {
    %c1_i32 = arith.constant 1 : i32
    %0 = arith.muli %arg1, %c1_i32 : i32
    %1 = arith.addi %0, %arg2 : i32
    %c0_i32 = arith.constant 0 : i32
    %2 = arith.minsi %1, %c0_i32 : i32
    %c0_i32_0 = arith.constant 0 : i32
    %c0_i32_1 = arith.constant 0 : i32
    return %arg0, %c0_i32_0, %2 : i32, i32, i32
  }
  func.func @transform_3(%arg0: i32, %arg1: i32, %arg2: i32) -> (i32, i32, i32, i32) {
    %c0_i32 = arith.constant 0 : i32
    %c0_i32_0 = arith.constant 0 : i32
    %c0_i32_1 = arith.constant 0 : i32
    return %arg0, %arg1, %c0_i32, %c0_i32_0 : i32, i32, i32, i32
  }
  func.func @transform_4(%arg0: i32, %arg1: i32, %arg2: i32) -> (i32, i32, i32, i32) {
    %c0_i32 = arith.constant 0 : i32
    %c0_i32_0 = arith.constant 0 : i32
    %c0_i32_1 = arith.constant 0 : i32
    return %arg0, %arg1, %c0_i32, %c0_i32_0 : i32, i32, i32, i32
  }
  func.func @transform_5(%arg0: i32, %arg1: i32, %arg2: i32) -> (i32, i32, i32, i32) {
    %c0_i32 = arith.constant 0 : i32
    %c0_i32_0 = arith.constant 0 : i32
    %c0_i32_1 = arith.constant 0 : i32
    return %arg0, %arg1, %c0_i32, %c0_i32_0 : i32, i32, i32, i32
  }
}

</mosaic_0001>

<bundles_post_ra>
// kernel: mean_cell_tables.1
= control target key start
LH: loop header
LB: loop body
LE: loop exit
PB: predicated region body
PF: predicated region fallthrough
CT: control target
= control target key end

     0   :  { %s1425_s18 = smov 0   ;;  %s1427_s19 = smov 0   ;;  %s1728_s0 = inlined_call_operand.vmem [shape: f32[2,4,256], index: 0, kind: input, shape index: {}]   ;;  %s1729_s1 = inlined_call_operand.vmem [shape: f32[2,4,256], index: 1, kind: input, shape index: {}]   ;;  %s1730_s2 = inlined_call_operand.vmem [shape: s32[2,1,256], index: 2, kind: input, shape index: {}]   ;;  %s1731_s3 = inlined_call_operand.vmem [shape: f32[2,1,4,128], index: 3, kind: output, shape index: {0}]   ;;  %s1732_s4 = inlined_call_operand.vmem [shape: f32[2,1,4,128], index: 4, kind: output, shape index: {1}]   ;;  %s1733_s5 = inlined_call_operand.vmem [shape: f32[2,1,1,128], index: 5, kind: output, shape index: {2}]  }
   0x1   :  { %s1429_s20 = smov 0  }
   0x2 LB: > { %s35_s21 = sadd.s32 1, %s1367_s19  ;;  %p963_p0 = scmp.ge.s32.totalorder %s1371_s20, 1  ;;  %s1371_s20 = sphi %s1429_s20, %s16_s20   ;;  %s1367_s19 = sphi %s1427_s19, %s1754_s19   ;;  %s1363_s18 = sphi %s1425_s18, %s1753_s18  }
   0x3   : > { %p37_p1 = scmp.ge.s32.totalorder %s35_s21, 2  ;;  %p293_p2 = scmp.lt.s32.totalorder %s1371_s20, 3 }
   0x5   : > { %s1756_s21 = smov (%p37_p1, %s35_s21), 0  ;;  %p294_p3 = pnand %p963_p0, %p293_p2 }
   0x6   : > { %p370_p4 = scmp.lt.s32.totalorder (!%p294_p3), %s1363_s18, 1  ;;  %v440_v0 = vlaneseq (!%p294_p3)  ;;  %v1389_v17 = vmov (!%p294_p3), 0.0   ;;  %v1523_v18 = vmov (!%p294_p3), 0.0   ;;  %v1525_v19 = vmov (!%p294_p3), 0.0  }
   0x7   : > { %297 = sbr.rel (%p294_p3) target bundleno = 371 (0x173), region = 32  ;;  %v1527_v20 = vmov (!%p294_p3), 0.0  }
   0x8   : > { %v1443_v1 = vshrl.u32 (!%p294_p3), %v440_v0, 7 }
   0xa   : > { %v1446_v2 = vadd.s32 (!%p294_p3), 8, %v1443_v1  ;;  %v1449_v3 = vadd.s32 (!%p294_p3), 16, %v1443_v1  ;;  %v1452_v4 = vadd.s32 (!%p294_p3), 24, %v1443_v1  ;;  %v1455_v5 = vadd.s32 (!%p294_p3), 32, %v1443_v1 }
   0xb   : > { %v1468_v6 = vadd.s32 (!%p294_p3), 40, %v1443_v1  ;;  %v1471_v7 = vadd.s32 (!%p294_p3), 48, %v1443_v1  ;;  %v1474_v8 = vadd.s32 (!%p294_p3), 56, %v1443_v1  ;;  %v1477_v9 = vadd.s32 (!%p294_p3), 64, %v1443_v1 }
   0xc   : > { %v1485_v10 = vadd.s32 (!%p294_p3), 72, %v1443_v1  ;;  %v1488_v11 = vadd.s32 (!%p294_p3), 80, %v1443_v1  ;;  %v1491_v12 = vadd.s32 (!%p294_p3), 88, %v1443_v1  ;;  %v1494_v13 = vadd.s32 (!%p294_p3), 96, %v1443_v1 }
   0xd   : > { %v1507_v14 = vadd.s32 (!%p294_p3), 104, %v1443_v1  ;;  %v1510_v15 = vadd.s32 (!%p294_p3), 112, %v1443_v1  ;;  %v1513_v16 = vadd.s32 (!%p294_p3), 120, %v1443_v1 }
   0xe   : > { %s1758_s18 = smov (!%p370_p4, %s1363_s18), 1 }
   0xf   : > { %s1041_s22 = sshll.u32 %s1758_s18, 3  ;;  %s968_s23 = sshll.u32 %s1758_s18, 1 }
  0x10   : > { %s1460_s26 = scalar_lea.vmem %s1728_s0, %s1041_s22  ;;  %s1465_s29 = scalar_lea.vmem %s1729_s1, %s1041_s22 }
  0x11   : > { %s1482_s7 = scalar_lea.vmem %s1730_s2, %s968_s23  ;;  %s969_s8 = sshll.u32 %s1758_s18, 2 }
  0x12   : > { %s1499_s11 = scalar_lea.vmem %s1731_s3, %s969_s8  ;;  %s1504_s14 = scalar_lea.vmem %s1732_s4, %s969_s8 }
  0x13   : > { %437 = vst [vmem:[%s1499_s11] sm:$0xf] %v1389_v17  ;;  %438 = vst [vmem:[%s1504_s14] sm:$0xf] %v1389_v17  ;;  %s1520_s17 = scalar_lea.vmem %s1733_s5, %s1758_s18  ;;  %s1529_s22 = smov 0  }
  0x14   : > { %439 = vst [vmem:[%s1520_s17] sm:$0x1] %v1389_v17 }
  0x15 LB: >> { %v1390_v21 = vmov 0.0|0.0   ;;  %vm1391_vm0 = vmmov 0   ;;  %v1392_v22 = vmov 0.0   ;;  %s971_s18 = sshll.u32 %s1387_s22, 7  ;;  %v1393_v25 = vmov 1.0|1.0   ;;  %s1387_s22 = sphi %s1529_s22, %s462_s22   ;;  %v1383_v20 = vphi %v1527_v20, %v1752_v20   ;;  %v1379_v19 = vphi %v1525_v19, %v1751_v19   ;;  %v1375_v18 = vphi %v1523_v18, %v1750_v18  }
  0x16   : >> { %1199 = vmatprep.subr.bf16.mxu0 %v1390_v21  ;;  %1126 = vmatprep.mubr.msk.f32.mxu0 %vm1391_vm0, %v1392_v22  ;;  %s1550_s23 = sshra.s32 %s971_s18, 7  ;;  %v1394_v35 = vmov 1.0   ;;  %s462_s22 = sadd.s32 1, %s1387_s22  }
  0x17   : >> { %1223 = vmatprep.subr.bf16.mxu1 %v1390_v21  ;;  %1161 = vmatprep.mubr.msk.f32.mxu1 %vm1391_vm0, %v1392_v22  ;;  %s475_s24 = scalar_lea.vmem %s1482_s7, %s1550_s23  ;;  %s972_s25 = sshll.u32 %s1550_s23, 2 }
  0x18   : >> { %v974_v23 = vld [vmem:[%s475_s24] ss:$0 sm:$0xff]  ;;  %s470_s27 = scalar_lea.vmem %s1460_s26, %s972_s25  ;;  %s473_s28 = scalar_lea.vmem %s1465_s29, %s972_s25 }
  0x19   : >> { %vm481_vm1 = vcmp.eq.s32.totalorder %v974_v23, %v1443_v1  ;;  %vm482_vm2 = vcmp.eq.s32.totalorder %v974_v23, %v1446_v2  ;;  %vm483_vm4 = vcmp.eq.s32.totalorder %v974_v23, %v1449_v3  ;;  %vm484_vm5 = vcmp.eq.s32.totalorder %v974_v23, %v1452_v4  ;;  %v471_v33 = vld [vmem:[%s470_s27] sm:$0xf]  ;;  %p459_p5 = scmp.ge.s32.totalorder %s462_s22, 2  }
  0x1a   : >> { %vm1556_vm3 = vmpackc.low %vm482_vm2, %vm481_vm1  ;;  %vm485_vm7 = vcmp.eq.s32.totalorder %v974_v23, %v1455_v5  ;;  %vm486_vm8 = vcmp.eq.s32.totalorder %v974_v23, %v1468_v6  ;;  %vm487_vm10 = vcmp.eq.s32.totalorder %v974_v23, %v1471_v7  ;;  %vm488_vm11 = vcmp.eq.s32.totalorder %v974_v23, %v1474_v8  ;;  %v474_v34 = vld [vmem:[%s473_s28] sm:$0xf] }
  0x1b   : >> { %1201 = vmatpush3.bf16.xpose.msk.msra.mxu0 %vm1556_vm3, %v1393_v25  ;;  %1225 = vmatpush3.bf16.xpose.msk.msra.mxu1 %vm1556_vm3, %v1393_v25  ;;  %vm1570_vm6 = vmpackc.low %vm484_vm5, %vm483_vm4  ;;  %vm489_vm13 = vcmp.eq.s32.totalorder %v974_v23, %v1477_v9  ;;  %vm490_vm14 = vcmp.eq.s32.totalorder %v974_v23, %v1485_v10  ;;  %vm491_vm1 = vcmp.eq.s32.totalorder %v974_v23, %v1488_v11  ;;  %v742_v45 = vld [vmem:[%s1499_s11] sm:$0xf] (%p459_p5) }
  0x1c   : >> { %1202 = vmatprep.subr.bf16.mxu0 %v1390_v21  ;;  %1226 = vmatprep.subr.bf16.mxu1 %v1390_v21  ;;  %vm1584_vm9 = vmpackc.low %vm486_vm8, %vm485_vm7  ;;  %vm492_vm2 = vcmp.eq.s32.totalorder %v974_v23, %v1491_v12  ;;  %vm493_vm5 = vcmp.eq.s32.totalorder %v974_v23, %v1494_v13  ;;  %vm494_vm7 = vcmp.eq.s32.totalorder %v974_v23, %v1507_v14  ;;  %v745_v46 = vld [vmem:[%s1504_s14] sm:$0xf] (%p459_p5) }
  0x1d   : >> { %vm1598_vm12 = vmpackc.low %vm488_vm11, %vm487_vm10  ;;  %vm495_vm10 = vcmp.eq.s32.totalorder %v974_v23, %v1510_v15  ;;  %vm496_vm11 = vcmp.eq.s32.totalorder %v974_v23, %v1513_v16  ;;  %v748_v47 = vld [vmem:[%s1520_s17] sm:$0x1] (%p459_p5) }
  0x1e   : >> { %vm1612_vm15 = vmpackc.low %vm490_vm14, %vm489_vm13 }
  0x1f   : >> { %vm1626_vm4 = vmpackc.low %vm492_vm2, %vm491_vm1 }
  0x20   : >> { %vm1640_vm8 = vmpackc.low %vm494_vm7, %vm493_vm5 }
  0x21   : >> { %vm1654_vm13 = vmpackc.low %vm496_vm11, %vm495_vm10 }
  0x23   : >> { %1204 = vmatpush3.bf16.xpose.msk.msra.mxu0 %vm1570_vm6, %v1393_v25  ;;  %1228 = vmatpush3.bf16.xpose.msk.msra.mxu1 %vm1570_vm6, %v1393_v25 }
  0x24   : >> { %1205 = vmatprep.subr.bf16.mxu0 %v1390_v21  ;;  %1229 = vmatprep.subr.bf16.mxu1 %v1390_v21 }
  0x2b   : >> { %1207 = vmatpush3.bf16.xpose.msk.msra.mxu0 %vm1584_vm9, %v1393_v25  ;;  %1231 = vmatpush3.bf16.xpose.msk.msra.mxu1 %vm1584_vm9, %v1393_v25 }
  0x2c   : >> { %1208 = vmatprep.subr.bf16.mxu0 %v1390_v21  ;;  %1232 = vmatprep.subr.bf16.mxu1 %v1390_v21 }
  0x33   : >> { %1210 = vmatpush3.bf16.xpose.msk.msra.mxu0 %vm1598_vm12, %v1393_v25  ;;  %1234 = vmatpush3.bf16.xpose.msk.msra.mxu1 %vm1598_vm12, %v1393_v25 }
  0x34   : >> { %1211 = vmatprep.subr.bf16.mxu0 %v1390_v21  ;;  %1235 = vmatprep.subr.bf16.mxu1 %v1390_v21 }
  0x3b   : >> { %1213 = vmatpush3.bf16.xpose.msk.msra.mxu0 %vm1612_vm15, %v1393_v25  ;;  %1237 = vmatpush3.bf16.xpose.msk.msra.mxu1 %vm1612_vm15, %v1393_v25 }
  0x3c   : >> { %1214 = vmatprep.subr.bf16.mxu0 %v1390_v21  ;;  %1238 = vmatprep.subr.bf16.mxu1 %v1390_v21 }
  0x43   : >> { %1216 = vmatpush3.bf16.xpose.msk.msra.mxu0 %vm1626_vm4, %v1393_v25  ;;  %1240 = vmatpush3.bf16.xpose.msk.msra.mxu1 %vm1626_vm4, %v1393_v25 }
  0x44   : >> { %1217 = vmatprep.subr.bf16.mxu0 %v1390_v21  ;;  %1241 = vmatprep.subr.bf16.mxu1 %v1390_v21 }
  0x4b   : >> { %1219 = vmatpush3.bf16.xpose.msk.msra.mxu0 %vm1640_vm8, %v1393_v25  ;;  %1243 = vmatpush3.bf16.xpose.msk.msra.mxu1 %vm1640_vm8, %v1393_v25 }
  0x4c   : >> { %1220 = vmatprep.subr.bf16.mxu0 %v1390_v21  ;;  %1244 = vmatprep.subr.bf16.mxu1 %v1390_v21 }
  0x53   : >> { %1222 = vmatpush3.bf16.xpose.msk.msra.mxu0 %vm1654_vm13, %v1393_v25  ;;  %1246 = vmatpush3.bf16.xpose.msk.msra.mxu1 %vm1654_vm13, %v1393_v25 }
  0x54   : >> { %1247 = vmatprep.subr.bf16.mxu0 %v1390_v21 }
  0x5a   : >> { %1127 = vmatmul.mubr.f32.vlgmr.msra.gmra.mrb[0].mxu0 %v471_v33  ;;  %1162 = vmatmul.mubr.f32.vlgmr.msra.gmra.mrb[0].mxu1 %v474_v34 }
  0x5b   : >> { %1249 = vmatpush3.bf16.xpose.msk.msra.mxu0 %vm1556_vm3, %v1393_v25  ;;  %1196 = vmatprep.mubr.msk.f32.mxu0 %vm1391_vm0, %v1392_v22 }
  0x5c   : >> { %1250 = vmatprep.subr.bf16.mxu0 %v1390_v21 }
  0x63   : >> { %1252 = vmatpush3.bf16.xpose.msk.msra.mxu0 %vm1570_vm6, %v1393_v25 }
  0x64   : >> { %1253 = vmatprep.subr.bf16.mxu0 %v1390_v21 }
  0x6b   : >> { %1255 = vmatpush3.bf16.xpose.msk.msra.mxu0 %vm1584_vm9, %v1393_v25 }
  0x6c   : >> { %1256 = vmatprep.subr.bf16.mxu0 %v1390_v21 }
  0x73   : >> { %1258 = vmatpush3.bf16.xpose.msk.msra.mxu0 %vm1598_vm12, %v1393_v25 }
  0x74   : >> { %1259 = vmatprep.subr.bf16.mxu0 %v1390_v21 }
  0x7b   : >> { %1261 = vmatpush3.bf16.xpose.msk.msra.mxu0 %vm1612_vm15, %v1393_v25 }
  0x7c   : >> { %1262 = vmatprep.subr.bf16.mxu0 %v1390_v21 }
  0x83   : >> { %1264 = vmatpush3.bf16.xpose.msk.msra.mxu0 %vm1626_vm4, %v1393_v25 }
  0x84   : >> { %1265 = vmatprep.subr.bf16.mxu0 %v1390_v21 }
  0x8b   : >> { %1267 = vmatpush3.bf16.xpose.msk.msra.mxu0 %vm1640_vm8, %v1393_v25 }
  0x8c   : >> { %1268 = vmatprep.subr.bf16.mxu0 %v1390_v21 }
  0x93   : >> { %1270 = vmatpush3.bf16.xpose.msk.msra.mxu0 %vm1654_vm13, %v1393_v25 }
  0x9a   : >> { %1197 = vmatmul.mubr.f32.vlgmr.msra.gmra.mrb[2].mxu0 %v1394_v35 }
 0x12d   : >> { %v595_v36 = vpop.f32.mrb[0].mxu0  ;;  %v666_v39 = vpop.f32.mrb[0].mxu1 }
 0x12e   : >> { %v599_v37 = vadd.f32 %v1383_v20, %v595_v36   ;;  %v1128_v38 = vpop.f32.mrb[1].mxu0  ;;  %v670_v40 = vadd.f32 %v1379_v19, %v666_v39   ;;  %v1163_v41 = vpop.f32.mrb[1].mxu1 }
 0x130   : >> { %v1751_v19 = vmov %v670_v40  ;;  %v1752_v20 = vmov %v599_v37  ;;  %v743_v48 = vadd.f32 (%p459_p5), %v742_v45, %v599_v37  ;;  %v746_v49 = vadd.f32 (%p459_p5), %v745_v46, %v670_v40 }
 0x132   : > { %744 = vst [vmem:[%s1499_s11] sm:$0xf] (%p459_p5), %v743_v48  ;;  %747 = vst [vmem:[%s1504_s14] sm:$0xf] (%p459_p5), %v746_v49 }
 0x16a   : > { %461 = sbr.rel (!%p459_p5) target bundleno = 21 (0x15), region = 106 }
 0x16d   : >> { %v737_v42 = vpop.f32.mrb[2].mxu0 }
 0x16e   : >> { %v741_v43 = vadd.f32 %v1375_v18, %v737_v42   ;;  %v1198_v44 = vpop.f32.mrb[3].mxu0 }
 0x170   : >> { %v1750_v18 = vmov %v741_v43  ;;  %v749_v50 = vadd.f32 (%p459_p5), %v748_v47, %v741_v43 }
 0x172   : > { %750 = vst [vmem:[%s1520_s17] sm:$0x1] %v749_v50 }
 0x173 PF: > { %s16_s20 = sadd.s32 1, %s1371_s20   ;;  %s1753_s18 = smov %s1367_s19 }
 0x174   : > { %p13_p6 = scmp.ge.s32.totalorder %s16_s20, 4   ;;  %s1754_s19 = smov %s1756_s21 }
 0x176   :  { %15 = sbr.rel (!%p13_p6) target bundleno = 2 (0x2), region = 117 }

</bundles_post_ra>
